<compile_context>
chip_gen: v6e
topology: v6e:2x2x1
jax: 0.10.0
libtpu: 0.0.40
codegen_flags: <defaults>
</compile_context>

<pallas_src>
import functools

import jax
import jax.numpy as jnp
from jax.experimental import pallas as pl
from jax.experimental.pallas import tpu as pltpu


def _concat_attention_kernel(ann_ref, pre_ref, va_ref, w_ann_ref,
                             ctx_ref, att_ref, *, matmul_dtype, valid_len):
    # Per grid step (one block of Bb batch elements):
    #   ann_ref  : (Bb, Lp, Dh)  encoder annotations (Lp = L padded to a multiple of 8)
    #   pre_ref  : (Bb, Ep)      hn_cat @ W_hn^T + bias (hoisted), E padded to 128-multiple
    #   va_ref   : (Bb, Ep)      per-batch energy vector (zero-padded lanes)
    #   w_ann_ref: (Dh, Ep)      annotation half of Wa^T, already in matmul_dtype (resident)
    #   ctx_ref  : (Bb, Dh)      context output
    #   att_ref  : (Bb, Lp)      attention output (wrapper slices/reshapes to (B, L, 1))
    Bb, Lp, Dh = ann_ref.shape
    Ep = w_ann_ref.shape[1]

    ann = ann_ref[...]                                             # (Bb, Lp, Dh)
    pre = pre_ref[...]                                             # (Bb, Ep)
    va = va_ref[...]                                               # (Bb, Ep)

    # Fold the batch block into M so the MXU sees one (Bb*Lp, Dh) @ (Dh, Ep) matmul.
    # Lp % 8 == 0 and Ep % 128 == 0, so both reshapes are layout no-ops.
    a2 = ann.reshape(Bb * Lp, Dh).astype(matmul_dtype)
    z2 = jnp.dot(a2, w_ann_ref[...],
                 preferred_element_type=jnp.float32)               # (Bb*Lp, Ep), f32 acc
    z = jnp.tanh(z2.reshape(Bb, Lp, Ep) + pre[:, None, :])         # (Bb, Lp, Ep)

    # energy = <z, va> along Ep: VPU multiply + lane reduce (padded lanes contribute 0).
    energy = jnp.sum(z * va[:, None, :], axis=-1)                  # (Bb, Lp)

    # Mask out the length padding (only if L was padded).
    if valid_len != Lp:
        lane = jax.lax.broadcasted_iota(jnp.int32, (Bb, Lp), 1)
        energy = jnp.where(lane < valid_len, energy, -jnp.inf)

    # Softmax over the length axis (lane axis). Exact normalization so rows sum to 1.
    m = jnp.max(energy, axis=-1, keepdims=True)
    e = jnp.exp(energy - m)
    att = e / jnp.sum(e, axis=-1, keepdims=True)                   # (Bb, Lp)
    att_ref[...] = att.astype(att_ref.dtype)

    # context[b, :] = sum_l att[b, l] * ann[b, l, :]  (broadcast mul + sublane reduce, f32).
    ctx = jnp.sum(att[:, :, None] * ann.astype(jnp.float32), axis=1)   # (Bb, Dh)
    ctx_ref[...] = ctx.astype(ctx_ref.dtype)


def _round_block_b(Bb, B):
    """Keep the batch block either == B (full) or a multiple of 8 (legal 2-D out blocks)."""
    Bb = min(Bb, B)
    if Bb >= B:
        return B
    Bb = max(8, (Bb // 8) * 8)
    return B if Bb >= B else Bb


def _choose_block_b(B, Lp, Dh, Ep, vmem_budget_bytes):
    """Pick Bb so M = Bb*Lp >= 256 (fills the MXU M dim), capped by a per-step VMEM budget
    that stays under the default scoped VMEM on every generation (v7x: 64 MiB physical)."""
    per_b = (2 * Lp * Dh * 4        # ann block, double-buffered
             + 2 * Lp * Ep * 4      # f32 z slab + tanh/exp temporaries
             + Lp * Dh * 4          # att*ann broadcast temp
             + 4 * Ep * 4 + Dh * 4 + 2 * Lp * 4)
    cap = max(1, vmem_budget_bytes // per_b)
    target = max(8, pl.cdiv(256, Lp))
    Bb = min(B, cap, target)
    # Prefer >= 2 grid steps when batch allows, so both v7x TensorCores get work
    # (the batch axis is marked "parallel").
    if Bb >= B and B >= 16:
        Bb = pl.cdiv(B, 2)
    return _round_block_b(Bb, B)


def concat_attention(hidden, annotations, Wa_w, Wa_b, va, bi_factor,
                     *, block_b=None, matmul_dtype=jnp.bfloat16,
                     vmem_budget_bytes=20 << 20):
    """Pallas implementation of ConcatAttention.forward.

    hidden:      (num_layers*bi_factor, B, H)  float32
    annotations: (B, L, Dh) with Dh = bi_factor*H
    Wa_w:        (E, E)  PyTorch nn.Linear weight (out, in), E = 2*Dh
    Wa_b:        (E,)
    va:          (B, E)
    returns (context (B, 1, Dh), attention (B, L, 1))
    """
    B, L, Dh = annotations.shape
    E = 2 * Dh

    # ---- wrapper-side glue (plain JAX: layout plumbing + hoisted hn projection) ----
    hn = hidden[-bi_factor:]                                   # (bf, B, H)
    hn_cat = jnp.transpose(hn, (1, 0, 2)).reshape(B, Dh)       # (B, Dh)

    # [hn_rep | ann] @ Wa^T == hn_cat @ W_hn^T + ann @ W_ann^T  (concat order preserved).
    W_hn_T = Wa_w[:, :Dh].T                                    # (Dh, E)
    W_ann_T = Wa_w[:, Dh:].T                                   # (Dh, E)

    # Hoisted hn projection: one batched (B, Dh) @ (Dh, E) matmul + bias outside the kernel.
    pre = (hn_cat @ W_hn_T + Wa_b).astype(jnp.float32)         # (B, E)
    va2 = va.astype(jnp.float32)                               # (B, E)

    # Pad E up to a multiple of 128 -> lane-dense z/va chain; padded va lanes are zero so
    # the energy is unchanged.
    Ep = pl.cdiv(E, 128) * 128
    if Ep != E:
        pre = jnp.pad(pre, ((0, 0), (0, Ep - E)))
        va2 = jnp.pad(va2, ((0, 0), (0, Ep - E)))
        W_ann_T = jnp.pad(W_ann_T, ((0, 0), (0, Ep - E)))
    W_ann_T = W_ann_T.astype(matmul_dtype)                     # single wrapper-side cast

    # Pad L up to a multiple of 8 -> in-kernel reshapes are layout no-ops (masked in-kernel).
    Lp = pl.cdiv(L, 8) * 8
    ann_in = annotations
    if Lp != L:
        ann_in = jnp.pad(ann_in, ((0, 0), (0, Lp - L), (0, 0)))

    # Batch-block the grid so each step feeds the MXU Bb*Lp rows and amortizes step overhead.
    if block_b is None:
        Bb = _choose_block_b(B, Lp, Dh, Ep, vmem_budget_bytes)
    else:
        Bb = _round_block_b(block_b, B)
    n_blocks = pl.cdiv(B, Bb)
    Bpad = n_blocks * Bb
    if Bpad != B:
        ann_in = jnp.pad(ann_in, ((0, Bpad - B), (0, 0), (0, 0)))
        pre = jnp.pad(pre, ((0, Bpad - B), (0, 0)))
        va2 = jnp.pad(va2, ((0, Bpad - B), (0, 0)))

    ctx2, att2 = pl.pallas_call(
        functools.partial(_concat_attention_kernel,
                          matmul_dtype=matmul_dtype, valid_len=L),
        out_shape=(
            jax.ShapeDtypeStruct((Bpad, Dh), annotations.dtype),
            jax.ShapeDtypeStruct((Bpad, Lp), annotations.dtype),
        ),
        grid_spec=pl.GridSpec(
            grid=(n_blocks,),
            in_specs=[
                pl.BlockSpec((Bb, Lp, Dh), lambda b: (b, 0, 0)),   # annotations
                pl.BlockSpec((Bb, Ep), lambda b: (b, 0)),          # pre = hn proj + bias (2D)
                pl.BlockSpec((Bb, Ep), lambda b: (b, 0)),          # va (2D)
                pl.BlockSpec((Dh, Ep), lambda b: (0, 0)),          # W_ann^T (grid-resident)
            ],
            out_specs=[
                pl.BlockSpec((Bb, Dh), lambda b: (b, 0)),          # context
                pl.BlockSpec((Bb, Lp), lambda b: (b, 0)),          # attention
            ],
        ),
        compiler_params=pltpu.CompilerParams(
            dimension_semantics=("parallel",)),
    )(ann_in, pre, va2, W_ann_T)

    # Free layout plumbing back to the PyTorch output shapes.
    ctx = ctx2[:B, None, :]                                    # (B, 1, Dh)
    att = att2[:B, :L, None]                                   # (B, L, 1)
    return ctx, att


def concat_attention_ref(hidden, annotations, Wa_w, Wa_b, va, bi_factor):
    """Pure-JAX reference mirroring the PyTorch forward exactly."""
    B, L, Dh = annotations.shape
    hn = hidden[-bi_factor:]
    hn_cat = jnp.transpose(hn, (1, 0, 2)).reshape(B, Dh)
    hn_rep = jnp.broadcast_to(hn_cat[:, None, :], (B, L, Dh))
    h_st = jnp.concatenate([hn_rep, annotations], axis=2)      # (B, L, E)
    z = jnp.tanh(h_st @ Wa_w.T + Wa_b)                         # (B, L, E)
    energy = jnp.einsum("ble,be->bl", z, va)[..., None]        # (B, L, 1)
    att = jax.nn.softmax(energy, axis=1)
    ctx = jnp.einsum("bl,bld->bd", att[..., 0], annotations)[:, None, :]
    return ctx, att


if __name__ == "__main__":
    # Module hyper-params (small, consistent with the PyTorch __init__)
    hidden_size = 16
    num_layers = 2
    bidirectional = True
    bi_factor = 2 if bidirectional else 1
    max_length = 8
    batch_size = 2
    Dh = bi_factor * hidden_size          # annotation feature dim = 32
    E = 2 * Dh                            # energy_input_dim = 64

    key = jax.random.PRNGKey(0)
    k_hid, k_ann, k_w, k_b, k_va = jax.random.split(key, 5)

    hidden = jax.random.normal(k_hid, (num_layers * bi_factor, batch_size, hidden_size), jnp.float32)
    annotations = jax.random.normal(k_ann, (batch_size, max_length, Dh), jnp.float32)

    Wa_w = jax.random.normal(k_w, (E, E), jnp.float32) * 0.1    # nn.Linear weight (out, in)
    Wa_b = jax.random.normal(k_b, (E,), jnp.float32) * 0.1      # nn.Linear bias
    va = jax.random.normal(k_va, (batch_size, E), jnp.float32)  # nn.Parameter randn(batch, E)

    ctx_exp, att_exp = concat_attention_ref(hidden, annotations, Wa_w, Wa_b, va, bi_factor)

    # --- default path: bf16 MXU matmul, f32 accumulation ---
    ctx, att = concat_attention(hidden, annotations, Wa_w, Wa_b, va, bi_factor)
    jax.block_until_ready((ctx, att))
    assert ctx.shape == (batch_size, 1, Dh) and att.shape == (batch_size, max_length, 1)
    # bf16 matmul error propagated through tanh/softmax is O(1e-2); strict f32 check below.
    assert jnp.allclose(ctx, ctx_exp, atol=5e-2, rtol=5e-2)
    assert jnp.allclose(att, att_exp, atol=5e-2, rtol=5e-2)
    # Exact softmax normalization -> attention rows sum to 1 to f32 rounding.
    assert jnp.allclose(jnp.sum(att[..., 0], axis=1), jnp.ones((batch_size,)), atol=1e-5)

    # --- strict path: f32 matmul, tight tolerance against the f32 reference ---
    ctx32, att32 = concat_attention(hidden, annotations, Wa_w, Wa_b, va, bi_factor,
                                    matmul_dtype=jnp.float32)
    jax.block_until_ready((ctx32, att32))
    assert jnp.allclose(ctx32, ctx_exp, atol=1e-4, rtol=1e-4)
    assert jnp.allclose(att32, att_exp, atol=1e-4, rtol=1e-4)
    assert jnp.allclose(jnp.sum(att32[..., 0], axis=1), jnp.ones((batch_size,)), atol=1e-5)

    print("KERNEL_OK")
</pallas_src>

<mosaic_0001>
module attributes {stable_mosaic.version = 11 : i64} {
  func.func @_concat_attention_kernel(%arg0: i32, %arg1: memref<2x8x32xf32, #tpu.memory_space<vmem>>, %arg2: memref<2x128xf32, #tpu.memory_space<vmem>>, %arg3: memref<2x128xf32, #tpu.memory_space<vmem>>, %arg4: memref<32x128xbf16, #tpu.memory_space<vmem>>, %arg5: memref<2x32xf32, #tpu.memory_space<vmem>>, %arg6: memref<2x8xf32, #tpu.memory_space<vmem>>) attributes {dimension_semantics = [#tpu.dimension_semantics<parallel>], iteration_bounds = array<i64: 1>, scalar_prefetch = 0 : i64, scratch_operands = 0 : i64, tpu.core_type = #tpu.core_type<tc>, window_params = [{transform_indices = @transform_0, window_bounds = array<i64: 2, 8, 32>}, {transform_indices = @transform_1, window_bounds = array<i64: 2, 128>}, {transform_indices = @transform_2, window_bounds = array<i64: 2, 128>}, {pipeline_mode = #tpu.pipeline_mode<synchronous>, transform_indices = @transform_3, window_bounds = array<i64: 32, 128>}, {transform_indices = @transform_4, window_bounds = array<i64: 2, 32>}, {transform_indices = @transform_5, window_bounds = array<i64: 2, 8>}]} {
    %c0 = arith.constant 0 : index
    %c0_0 = arith.constant 0 : index
    %c0_1 = arith.constant 0 : index
    %0 = vector.load %arg1[%c0, %c0_0, %c0_1] : memref<2x8x32xf32, #tpu.memory_space<vmem>>, vector<2x8x32xf32>
    %c0_2 = arith.constant 0 : index
    %c0_3 = arith.constant 0 : index
    %1 = vector.load %arg2[%c0_2, %c0_3] : memref<2x128xf32, #tpu.memory_space<vmem>>, vector<2x128xf32>
    %c0_4 = arith.constant 0 : index
    %c0_5 = arith.constant 0 : index
    %2 = vector.load %arg3[%c0_4, %c0_5] : memref<2x128xf32, #tpu.memory_space<vmem>>, vector<2x128xf32>
    %3 = vector.shape_cast %0 : vector<2x8x32xf32> to vector<16x32xf32>
    %4 = arith.truncf %3 : vector<16x32xf32> to vector<16x32xbf16>
    %c0_6 = arith.constant 0 : index
    %c0_7 = arith.constant 0 : index
    %5 = vector.load %arg4[%c0_6, %c0_7] : memref<32x128xbf16, #tpu.memory_space<vmem>>, vector<32x128xbf16>
    %cst = arith.constant dense<0.000000e+00> : vector<16x128xf32>
    %6 = tpu.matmul %4, %5, %cst {dimension_numbers = #tpu.dot_dimension_numbers<[1], [0], [0], [1], [0, 0, 1, 1], [], []>} : vector<16x32xbf16>, vector<32x128xbf16>, vector<16x128xf32> -> vector<16x128xf32>
    %7 = vector.shape_cast %6 : vector<16x128xf32> to vector<2x8x128xf32>
    %8 = vector.shape_cast %1 : vector<2x128xf32> to vector<2x1x128xf32>
    %9 = vector.broadcast %8 : vector<2x1x128xf32> to vector<2x8x128xf32>
    %10 = arith.addf %7, %9 : vector<2x8x128xf32>
    %11 = math.tanh %10 : vector<2x8x128xf32>
    %12 = vector.shape_cast %2 : vector<2x128xf32> to vector<2x1x128xf32>
    %13 = vector.broadcast %12 : vector<2x1x128xf32> to vector<2x8x128xf32>
    %14 = arith.mulf %11, %13 : vector<2x8x128xf32>
    %cst_8 = arith.constant dense<0.000000e+00> : vector<2x8xf32>
    %15 = vector.multi_reduction <add>, %14, %cst_8 [2] : vector<2x8x128xf32> to vector<2x8xf32>
    %cst_9 = arith.constant dense<0xFF800000> : vector<2xf32>
    %16 = vector.multi_reduction <maximumf>, %15, %cst_9 [1] : vector<2x8xf32> to vector<2xf32>
    %17 = vector.shape_cast %16 : vector<2xf32> to vector<2x1xf32>
    %18 = vector.broadcast %17 : vector<2x1xf32> to vector<2x8xf32>
    %19 = arith.subf %15, %18 : vector<2x8xf32>
    %20 = math.exp %19 : vector<2x8xf32>
    %cst_10 = arith.constant dense<0.000000e+00> : vector<2xf32>
    %21 = vector.multi_reduction <add>, %20, %cst_10 [1] : vector<2x8xf32> to vector<2xf32>
    %22 = vector.shape_cast %21 : vector<2xf32> to vector<2x1xf32>
    %23 = vector.broadcast %22 : vector<2x1xf32> to vector<2x8xf32>
    %24 = arith.divf %20, %23 : vector<2x8xf32>
    %c0_11 = arith.constant 0 : index
    %c0_12 = arith.constant 0 : index
    %25 = vector.load %arg6[%c0_11, %c0_12] : memref<2x8xf32, #tpu.memory_space<vmem>>, vector<2x8xf32>
    tpu.vector_store %arg6[%c0_11, %c0_12], %24 {strides = array<i32>} : memref<2x8xf32, #tpu.memory_space<vmem>>, vector<2x8xf32>,
    %26 = vector.shape_cast %24 : vector<2x8xf32> to vector<2x8x1xf32>
    %27 = vector.broadcast %26 : vector<2x8x1xf32> to vector<2x8x32xf32>
    %28 = arith.mulf %27, %0 : vector<2x8x32xf32>
    %cst_13 = arith.constant dense<0.000000e+00> : vector<2x32xf32>
    %29 = vector.multi_reduction <add>, %28, %cst_13 [1] : vector<2x8x32xf32> to vector<2x32xf32>
    %c0_14 = arith.constant 0 : index
    %c0_15 = arith.constant 0 : index
    %30 = vector.load %arg5[%c0_14, %c0_15] : memref<2x32xf32, #tpu.memory_space<vmem>>, vector<2x32xf32>
    tpu.vector_store %arg5[%c0_14, %c0_15], %29 {strides = array<i32>} : memref<2x32xf32, #tpu.memory_space<vmem>>, vector<2x32xf32>,
    return
  }
  func.func @transform_0(%arg0: i32) -> (i32, i32, i32) {
    %c0_i32 = arith.constant 0 : i32
    %c0_i32_0 = arith.constant 0 : i32
    %c0_i32_1 = arith.constant 0 : i32
    return %arg0, %c0_i32, %c0_i32_0 : i32, i32, i32
  }
  func.func @transform_1(%arg0: i32) -> (i32, i32) {
    %c0_i32 = arith.constant 0 : i32
    %c0_i32_0 = arith.constant 0 : i32
    return %arg0, %c0_i32 : i32, i32
  }
  func.func @transform_2(%arg0: i32) -> (i32, i32) {
    %c0_i32 = arith.constant 0 : i32
    %c0_i32_0 = arith.constant 0 : i32
    return %arg0, %c0_i32 : i32, i32
  }
  func.func @transform_3(%arg0: i32) -> (i32, i32) {
    %c0_i32 = arith.constant 0 : i32
    %c0_i32_0 = arith.constant 0 : i32
    %c0_i32_1 = arith.constant 0 : i32
    return %c0_i32, %c0_i32_0 : i32, i32
  }
  func.func @transform_4(%arg0: i32) -> (i32, i32) {
    %c0_i32 = arith.constant 0 : i32
    %c0_i32_0 = arith.constant 0 : i32
    return %arg0, %c0_i32 : i32, i32
  }
  func.func @transform_5(%arg0: i32) -> (i32, i32) {
    %c0_i32 = arith.constant 0 : i32
    %c0_i32_0 = arith.constant 0 : i32
    return %arg0, %c0_i32 : i32, i32
  }
}

</mosaic_0001>

<bundles_post_ra>
// kernel: tpu_custom_call.1
= control target key start
LH: loop header
LB: loop body
LE: loop exit
PB: predicated region body
PF: predicated region fallthrough
CT: control target
= control target key end

     0   :  { %11 = vsyncpa [#allocation3], 0  ;;  %s594_s0 = inlined_call_operand.hbm [shape: f32[2,8,32], index: 0, kind: input, shape index: {}]   ;;  %s595_s1 = inlined_call_operand.hbm [shape: f32[2,128], index: 1, kind: input, shape index: {}]   ;;  %s596_s2 = inlined_call_operand.vmem [shape: f32[2,128], index: 2, kind: input, shape index: {}]   ;;  %s597_s3 = inlined_call_operand.hbm [shape: bf16[32,128], index: 3, kind: input, shape index: {}]   ;;  %s598_s4 = inlined_call_operand.hbm [shape: f32[2,32], index: 4, kind: output, shape index: {0}]   ;;  %s599_s5 = inlined_call_operand.hbm [shape: f32[2,8], index: 5, kind: output, shape index: {1}]  }
   0x1   :  { %12 = vsyncpa [#allocation6], 0 }
   0x2   :  { %13 = vsyncpa [#allocation4], 0 }
   0x3   :  { %14 = vsyncpa [#allocation10], 0  ;;  %s501_s18 = smov [#allocation5]   ;;  %s502_s20 = smov [#allocation2]  }
   0x4   :  { %s33_s19 = sshll.u32 %s501_s18, 4  ;;  %s20_s21 = sshll.u32 %s502_s20, 4  ;;  %s34_s19 = int_to_ptr.vmem [resolvable:$true] %s33_s19  ;;  %s21_s21 = int_to_ptr.vmem [resolvable:$true] %s20_s21 }
   0x5   :  { %s401_s22 = scalar_lea.vmem %s34_s19, 32  ;;  %p406_p1 = scmp.lt.s32.totalorder %s34_s19, %s34_s19 }
   0x6   :  { %p402_p0 = scmp.ne.s32.totalorder %s34_s19, %s401_s22  ;;  %p407_p2 = scmp.lt.s32.totalorder %s401_s22, %s401_s22 }
   0x8   :  { %p408_p3 = por %p407_p2, %p406_p1 }
   0xa   :  { %p409_p4 = pnand %p408_p3, %p402_p0 }
   0xc   :  { %412 = shalt.err (!%p409_p4)
}
   0xd   :  { %36 = dma.hbm_to_vmem [thread:$0]  %s595_s1, 32, %s34_s19, [#allocation6]  }
   0xe   :  { %s421_s25 = scalar_lea.vmem %s21_s21, 256  ;;  %p426_p6 = scmp.lt.s32.totalorder %s21_s21, %s21_s21 }
   0xf   :  { %p422_p5 = scmp.ne.s32.totalorder %s21_s21, %s421_s25  ;;  %p427_p7 = scmp.lt.s32.totalorder %s421_s25, %s421_s25 }
  0x11   :  { %p428_p8 = por %p427_p7, %p426_p6 }
  0x13   :  { %p429_p9 = pnand %p428_p8, %p422_p5 }
  0x15   :  { %432 = shalt.err (!%p429_p9)
}
  0x16   :  { %s503_s26 = smov 128   ;;  %s504_s27 = smov 8  }
  0x17   :  { %26 = dma.hbm_to_vmem [thread:$0]  %s594_s0, 256, %s21_s21, [#allocation3], %s503_s26, %s503_s26, %s504_s27  }
  0x18   :  { %s505_s30 = smov [#allocation7]  }
  0x19   :  { %s44_s6 = sshll.u32 %s505_s30, 4  ;;  %s45_s6 = int_to_ptr.vmem [resolvable:$true] %s44_s6 }
  0x1a   :  { %s441_s7 = scalar_lea.vmem %s45_s6, 256  ;;  %p446_p11 = scmp.lt.s32.totalorder %s45_s6, %s45_s6 }
  0x1b   :  { %p442_p10 = scmp.ne.s32.totalorder %s45_s6, %s441_s7  ;;  %p447_p12 = scmp.lt.s32.totalorder %s441_s7, %s441_s7 }
  0x1d   :  { %p448_p13 = por %p447_p12, %p446_p11 }
  0x1f   :  { %p449_p0 = pnand %p448_p13, %p442_p10 }
  0x21   :  { %452 = shalt.err (!%p449_p0)
}
  0x22   :  { %s506_s1 = smov 64   ;;  %s507_s8 = smov 4  }
  0x23   :  { %50 = dma.hbm_to_vmem [thread:$0]  %s597_s3, 256, %s45_s6, [#allocation6], %s506_s1, %s506_s1, %s507_s8  }
  0x24   :  { %493 = dma.done.wait [#allocation3], 256  }
  0x25   :  { %494 = vsyncadd [#allocation3], 4294967040 }
  0x26   :  { %495 = dma.done.wait [#allocation6], 288  }
  0x27   :  { %496 = vsyncadd [#allocation6], 4294967008  ;;  %v508_v0 = vmov 0.0   ;;  %vm509_vm0 = vmmov 0   ;;  %v379_v1 = vld [vmem:[#allocation7 + $0x8] sm:$0xff]   ;;  %v380_v2 = vld [vmem:[#allocation7] sm:$0xff]   ;;  %v139_v8 = vlaneseq }
  0x28   :  { %356 = vmatprep.subr.bf16.mxu0 %v508_v0  ;;  %360 = vmatprep.mubr.msk.bf16.mxu0 %vm509_vm0, %v508_v0  ;;  %v553_v3 = vld [vmem:[#allocation2] sm:$0xff]  ;;  %v555_v4 = vld [vmem:[#allocation2 + $0x8] sm:$0xff]  ;;  %vm82_vm1 = vcmask 261120   ;;  %v510_v6 = vmov 1966171168   ;;  %vm215_vm2 = vcmask 1041409  }
  0x29   :  { %357 = vmatpush3.bf16.msra.mxu0 %v379_v1  ;;  %v65_v5 = vpack.c.bf16 %v555_v4, %v553_v3  ;;  %v137_v7 = vunpack.c.l.s4 %v510_v6  ;;  %v560_v10 = vshrl.u32 %v139_v8, 7  ;;  %v351_v12 = vld.sshfl [vmem:[#allocation5] sm:$0x11 pattern:$0x75316420]  ;;  %v206_v35 = vand.u32 127, %v139_v8 }
  0x2a   :  { %358 = vmatprep.subr.bf16.mxu0 %v508_v0  ;;  %v135_v15 = vcombine.high %v351_v12, %v351_v12  ;;  %v352_v25 = vld.sshfl [vmem:[%s596_s2] sm:$0x11 pattern:$0x75316420]  ;;  %vm218_vm3 = vcmask 58368   ;;  %v511_v43 = vmov 0  }
  0x2b   :  { %v138_v9 = vunpack.c.0.s8 %v137_v7  ;;  %v564_v14 = vsub.s32 0, %v560_v10  ;;  %v172_v26 = vcombine.high %v352_v25, %v352_v25  ;;  %v209_v37 = vsub.s32 %v206_v35, %v560_v10  ;;  %378 = vset.pattern.permute.xlu0 %v511_v43  ;;  %377 = vset.pattern.permute.xlu1 %v511_v43  ;;  %s512_s2 = smov [#allocation9]  }
  0x2c   :  { %v229_v44 = vsub.s32 1, %v560_v10  ;;  %s334_s11 = sshll.u32 %s512_s2, 4  ;;  %s335_s11 = int_to_ptr.vmem [resolvable:$true] %s334_s11 }
  0x2d   :  { %359 = vmatpush3.bf16.msra.mxu0 %v380_v2  ;;  %v141_v11 = vsub.s32 %v138_v9, %v560_v10  ;;  %s453_s12 = scalar_lea.vmem %s335_s11, 32  ;;  %p458_p2 = scmp.lt.s32.totalorder %s335_s11, %s335_s11 }
  0x2e   :  { %p454_p1 = scmp.ne.s32.totalorder %s335_s11, %s453_s12  ;;  %p459_p3 = scmp.lt.s32.totalorder %s453_s12, %s453_s12 }
  0x2f   :  { %v142_v13 = vrot.slane %v351_v12, %v141_v11  ;;  %v149_v17 = vrot.slane %v135_v15, %v141_v11  ;;  %v179_v27 = vrot.slane %v352_v25, %v141_v11  ;;  %v186_v29 = vrot.slane %v172_v26, %v141_v11 }
  0x30   :  { %361 = vmatmul.mubr.msk.bf16.vlgmr.msra.gmra.mxu0 %vm82_vm1, %v65_v5  ;;  %p460_p4 = por %p459_p3, %p458_p2 }
  0x31   :  { %v153_v16 = vrot.slane %v142_v13, %v564_v14  ;;  %v157_v20 = vrot.slane %v149_v17, %v564_v14  ;;  %v190_v28 = vrot.slane %v179_v27, %v564_v14  ;;  %v194_v32 = vrot.slane %v186_v29, %v564_v14 }
  0x32   :  { %p461_p5 = pnand %p460_p4, %p454_p1 }
  0xf0   :  { %v120_v18 = vpop.f32.mrf.mxu0 }
  0xf1   :  { %v160_v19 = vadd.f32 %v153_v16, %v120_v18 }
  0xf2   :  { %v362_v21 = vpop.f32.mrf.mxu0 }
  0xf3   :  { %381 = vtanh.f32 %v160_v19 }
  0xf4   :  { %v123_v22 = vpop.f32.mrf.mxu0 }
  0xf5   :  { %v161_v23 = vadd.f32 %v157_v20, %v123_v22 }
  0xf6   :  { %v363_v24 = vpop.f32.mrf.mxu0 }
  0xf7   :  { %383 = vtanh.f32 %v161_v23 }
 0x100   :  { %v382_v30 = vpop.eup %381 }
 0x101   :  { %v197_v31 = vmul.f32 %v382_v30, %v190_v28 }
 0x103   :  { %199 = vadd.xlane.f32.xlu0 %v197_v31 }
 0x104   :  { %v384_v33 = vpop.eup %383 }
 0x105   :  { %v198_v34 = vmul.f32 %v384_v33, %v194_v32 }
 0x107   :  { %201 = vadd.xlane.f32.xlu0 %v198_v34 }
 0x18c   :  { %v200_v36 = vpop.xlane.xlu0 %199 }
 0x18d   :  { %v210_v39 = vrot.slane %v200_v36, %v209_v37 }
 0x190   :  { %v202_v38 = vpop.xlane.xlu0 %201 }
 0x191   :  { %v214_v40 = vrot.slane %v202_v38, %v209_v37 }
 0x193   :  { %v216_v41 = vsel %vm215_vm2, %v214_v40, %v210_v39 }
 0x194   :  { %v219_v42 = vsel %vm218_vm3, %v216_v41, -inf }
 0x195   :  { %220 = vmax.xlane.f32.xlu1 %v219_v42 }
 0x21e   :  { %v221_v45 = vpop.xlane.xlu1 %220 }
 0x21f   :  { %v226_v46 = vrot.slane %v221_v45, %v564_v14  ;;  %v230_v47 = vrot.slane %v221_v45, %v229_v44 }
 0x221   :  { %v233_v48 = vsub.f32 %v200_v36, %v226_v46  ;;  %v234_v49 = vsub.f32 %v202_v38, %v230_v47 }
 0x223   :  { %v235_v50 = vmul.f32 1.442695, %v233_v48  ;;  %v237_v51 = vmul.f32 1.442695, %v234_v49 }
 0x225   :  { %385 = vpow2.f32 %v235_v50 }
 0x226   :  { %387 = vpow2.f32 %v237_v51 }
 0x232   :  { %v386_v52 = vpop.eup %385 }
 0x233   :  { %v388_v53 = vpop.eup %387  ;;  %242 = vperm.xlu1 %377, %v386_v52  }
 0x234   :  { %245 = vperm.xlu0 %378, %v388_v53  }
 0x2ae   :  { %v243_v54 = vpop.permute.xlu1 %242 }
 0x2af   :  { %v246_v55 = vpop.permute.xlu0 %245  ;;  %v250_v56 = vrot.slane %v243_v54, %v209_v37 }
 0x2b0   :  { %v254_v57 = vrot.slane %v246_v55, %v209_v37 }
 0x2b2   :  { %v255_v58 = vsel %vm215_vm2, %v254_v57, %v250_v56 }
 0x2b3   :  { %v257_v59 = vsel %vm218_vm3, %v255_v58, 0.0 }
 0x2b4   :  { %258 = vadd.xlane.f32.xlu1 %v257_v59 }
 0x33d   :  { %v259_v60 = vpop.xlane.xlu1 %258 }
 0x33e   :  { %v264_v61 = vrot.slane %v259_v60, %v564_v14  ;;  %v268_v62 = vrot.slane %v259_v60, %v229_v44 }
 0x340   :  { %389 = vrcp.f32 %v264_v61 }
 0x341   :  { %391 = vrcp.f32 %v268_v62 }
 0x34d   :  { %v390_v63 = vpop.eup %389 }
 0x34e   :  { %v272_v0 = vmul.f32 %v390_v63, %v386_v52  ;;  %v392_v1 = vpop.eup %391 }
 0x34f   :  { %v274_v2 = vmul.f32 %v392_v1, %v388_v53 }
 0x350   :  { %278 = vperm.xlu0 %378, %v272_v0  }
 0x354   :  { %281 = vperm.xlu0 %378, %v274_v2  }
 0x3cb   :  { %v279_v5 = vpop.permute.xlu0 %278 }
 0x3cc   :  { %v296_v6 = vmul.f32 %v279_v5, %v553_v3  ;;  %v286_v10 = vrot.slane %v279_v5, %v209_v37 }
 0x3ce   :  { %v298_v7 = vsel %vm82_vm1, %v296_v6, 0.0 }
 0x3cf   :  { %v299_v8 = vrot.slane %v298_v7, 4  ;;  %v282_v9 = vpop.permute.xlu0 %281 }
 0x3d0   :  { %v290_v11 = vrot.slane %v282_v9, %v209_v37  ;;  %v297_v12 = vmul.f32 %v282_v9, %v555_v4 }
 0x3d1   :  { %v300_v13 = vadd.f32 %v299_v8, %v298_v7 }
 0x3d2   :  { %v305_v14 = vsel %vm82_vm1, %v297_v12, 0.0  ;;  %v291_v15 = vsel %vm215_vm2, %v290_v11, %v286_v10 }
 0x3d3   :  { %v301_v16 = vrot.slane %v300_v13, 2  ;;  %v306_v17 = vrot.slane %v305_v14, 4  ;;  %293 = vst.msk [vmem:[#allocation9] sm:$0x3] %vm218_vm3, %v291_v15 }
 0x3d4   :  { %464 = shalt.err (!%p461_p5)
}
 0x3d5   :  { %337 = dma.vmem_to_hbm [thread:$0]  %s335_s11, 32, %s599_s5, [#allocation10]   ;;  %v302_v3 = vadd.f32 %v301_v16, %v300_v13  ;;  %v307_v4 = vadd.f32 %v306_v17, %v305_v14  ;;  %vm316_vm4 = vcmask 254976  }
 0x3d6   :  { %s513_s15 = smov [#allocation8]  }
 0x3d7   :  { %v308_v18 = vrot.slane %v307_v4, 2  ;;  %v303_v19 = vrot.slane %v302_v3, 1  ;;  %s324_s16 = sshll.u32 %s513_s15, 4  ;;  %s325_s16 = int_to_ptr.vmem [resolvable:$true] %s324_s16 }
 0x3d8   :  { %s473_s17 = scalar_lea.vmem %s325_s16, 32  ;;  %p478_p7 = scmp.lt.s32.totalorder %s325_s16, %s325_s16 }
 0x3d9   :  { %v309_v20 = vadd.f32 %v308_v18, %v307_v4  ;;  %v304_v23 = vadd.f32 %v303_v19, %v302_v3  ;;  %p474_p6 = scmp.ne.s32.totalorder %s325_s16, %s473_s17  ;;  %p479_p8 = scmp.lt.s32.totalorder %s473_s17, %s473_s17 }
 0x3db   :  { %v310_v21 = vrot.slane %v309_v20, 1  ;;  %p480_p9 = por %p479_p8, %p478_p7 }
 0x3dd   :  { %v311_v22 = vadd.f32 %v310_v21, %v309_v20  ;;  %p481_p10 = pnand %p480_p9, %p474_p6 }
 0x3df   :  { %v314_v24 = vsel %vm215_vm2, %v311_v22, %v304_v23 }
 0x3e0   :  { %317 = vst.msk [vmem:[#allocation8] sm:$0x3] %vm316_vm4, %v314_v24 }
 0x3e1   :  { %484 = shalt.err (!%p481_p10)
}
 0x3e2   :  { %327 = dma.vmem_to_hbm [thread:$0]  %s325_s16, 32, %s598_s4, [#allocation4]  }
 0x3e3   :  { %497 = dma.done.wait [#allocation4], 32  }
 0x3e4   :  { %498 = vsyncadd [#allocation4], 4294967264 }
 0x3e5   :  { %499 = dma.done.wait [#allocation10], 32  }
 0x3e6   :  { %500 = vsyncadd [#allocation10], 4294967264 }
 0x3e7   :  { %344 = vsyncpa [#allocation3], 1 }
 0x3e8   :  { %345 = vsyncpa [#allocation6], 1 }
 0x3e9   :  { %346 = vsyncpa [#allocation4], 1 }
 0x3ea   :  { %347 = vsyncpa [#allocation10], 1 }

</bundles_post_ra>
